<compile_context>
chip_gen: v5e
topology: v5e:2x2
jax: 0.10.0
libtpu: 0.0.40
codegen_flags: <defaults>
</compile_context>

<pallas_src>
import jax
import jax.numpy as jnp
from jax.experimental import pallas as pl
from jax.experimental.pallas import tpu as pltpu


_MAX_TB = 2048    # max batch tile (rows); capped by the 8-rounded batch
_SUBLANE = 8


def _round_up(x, m):
    return (x + m - 1) // m * m


def _batch_tiling(B):
    """Pad B only to a sublane multiple; tile = min(_MAX_TB, padded B)."""
    B_pad = _round_up(B, _SUBLANE)
    TB = min(_MAX_TB, B_pad)
    return B_pad, TB


# ----------------------------------------------------------------------------
# Kernels
# ----------------------------------------------------------------------------
def _psi_linear_kernel(x_ref, w_ref, o_ref):
    # y = x @ W  (single MXU matmul per batch tile, f32 accumulation)
    o_ref[...] = jnp.dot(x_ref[...], w_ref[...], preferred_element_type=jnp.float32)


def _psi_mlp_kernel(x_ref, w1_ref, b1_ref, w2_ref, b2_ref, o_ref):
    # h = relu(x @ W1 + b1);  y = h @ W2 + b2   (fused two-matmul kernel).
    # Bias add / ReLU stay in f32; h is cast to the weight dtype so the second
    # matmul also runs at the operand precision (no-op for f32 operands).
    h = jnp.dot(x_ref[...], w1_ref[...], preferred_element_type=jnp.float32)
    h = jnp.maximum(h + b1_ref[...], 0.0).astype(w2_ref.dtype)
    o_ref[...] = (
        jnp.dot(h, w2_ref[...], preferred_element_type=jnp.float32) + b2_ref[...]
    )


# ----------------------------------------------------------------------------
# Wrappers
# ----------------------------------------------------------------------------
def psi_forward_linear(x, w, action_size, feature_size,
                       compute_dtype=jnp.float32):
    """use_network=False path: y = x @ w, reshaped to (-1, A, F).

    x: (B, S) float32;  w: (S, A*F) float32 (PyTorch weight transposed to (in, out)).
    compute_dtype: dtype of the MXU operands (bf16 halves HBM read traffic;
    accumulation and output remain f32).
    """
    B, S = x.shape
    AF = w.shape[1]
    assert AF == action_size * feature_size

    B_pad, TB = _batch_tiling(B)
    if B_pad != B:
        x = jnp.pad(x, ((0, B_pad - B), (0, 0)))
    x = x.astype(compute_dtype)
    w = w.astype(compute_dtype)

    grid = pl.cdiv(B_pad, TB)   # ragged last block handled by Pallas (masked)
    itemsize = jnp.dtype(compute_dtype).itemsize
    cost = pl.CostEstimate(
        flops=2 * B_pad * S * AF,
        transcendentals=0,
        bytes_accessed=itemsize * (B_pad * S + S * AF) + 4 * B_pad * AF,
    )
    out = pl.pallas_call(
        _psi_linear_kernel,
        out_shape=jax.ShapeDtypeStruct((B_pad, AF), jnp.float32),
        grid_spec=pl.GridSpec(
            grid=(grid,),
            in_specs=[
                pl.BlockSpec((TB, S), lambda i: (i, 0)),   # batch-tiled, pipelined
                pl.BlockSpec((S, AF), lambda i: (0, 0)),   # weight stays VMEM-resident
            ],
            out_specs=pl.BlockSpec((TB, AF), lambda i: (i, 0)),  # lane-dense (AF=128)
        ),
        compiler_params=pltpu.CompilerParams(
            dimension_semantics=("parallel",),
        ),
        cost_estimate=cost,
    )(x, w)
    return out[:B].reshape(-1, action_size, feature_size)


def psi_forward_network(x, w1, b1, w2, b2, action_size, feature_size,
                        compute_dtype=jnp.float32):
    """use_network=True path: y = relu(x@w1+b1)@w2+b2, reshaped to (-1, A, F).

    x: (B, S);  w1: (S, F);  b1: (1, F);  w2: (F, A*F);  b2: (1, A*F).
    All weights in (in, out) layout (PyTorch weights transposed).
    """
    B, S = x.shape
    F = w1.shape[1]
    AF = w2.shape[1]
    assert AF == action_size * feature_size

    # Pad the hidden dim to a lane-dense multiple of 128.  Extra hidden units
    # have zero weights/bias, ReLU(0) = 0, and the zero-padded rows of w2
    # contribute nothing, so the result is unchanged while the intermediate h
    # becomes a full-lane vreg tile.
    F_pad = max(128, _round_up(F, 128))
    if F_pad != F:
        w1 = jnp.pad(w1, ((0, 0), (0, F_pad - F)))
        b1 = jnp.pad(b1, ((0, 0), (0, F_pad - F)))
        w2 = jnp.pad(w2, ((0, F_pad - F), (0, 0)))

    B_pad, TB = _batch_tiling(B)
    if B_pad != B:
        x = jnp.pad(x, ((0, B_pad - B), (0, 0)))

    x = x.astype(compute_dtype)
    w1 = w1.astype(compute_dtype)
    w2 = w2.astype(compute_dtype)
    b1 = b1.astype(jnp.float32)   # bias add / ReLU epilogue stays f32
    b2 = b2.astype(jnp.float32)

    grid = pl.cdiv(B_pad, TB)
    itemsize = jnp.dtype(compute_dtype).itemsize
    cost = pl.CostEstimate(
        flops=2 * B_pad * (S * F_pad + F_pad * AF),
        transcendentals=0,
        bytes_accessed=itemsize * (B_pad * S + S * F_pad + F_pad * AF)
        + 4 * (F_pad + AF + B_pad * AF),
    )
    out = pl.pallas_call(
        _psi_mlp_kernel,
        out_shape=jax.ShapeDtypeStruct((B_pad, AF), jnp.float32),
        grid_spec=pl.GridSpec(
            grid=(grid,),
            in_specs=[
                pl.BlockSpec((TB, S), lambda i: (i, 0)),        # batch-tiled x
                pl.BlockSpec((S, F_pad), lambda i: (0, 0)),     # weights/biases stay
                pl.BlockSpec((1, F_pad), lambda i: (0, 0)),     # VMEM-resident across
                pl.BlockSpec((F_pad, AF), lambda i: (0, 0)),    # all grid steps
                pl.BlockSpec((1, AF), lambda i: (0, 0)),
            ],
            out_specs=pl.BlockSpec((TB, AF), lambda i: (i, 0)),
        ),
        compiler_params=pltpu.CompilerParams(
            dimension_semantics=("parallel",),
        ),
        cost_estimate=cost,
    )(x, w1, b1, w2, b2)
    return out[:B].reshape(-1, action_size, feature_size)


# ----------------------------------------------------------------------------
# Main
# ----------------------------------------------------------------------------
if __name__ == "__main__":
    state_size = 32
    action_size = 4
    feature_size = 32
    AF = action_size * feature_size  # 128

    key = jax.random.PRNGKey(0)
    kx, kx2, kx3, k1, k2, k3, k4 = jax.random.split(key, 7)

    # Weights (deterministic synthetic init; folded_init is not reproduced).
    w_ones = jnp.ones((state_size, AF), dtype=jnp.float32)  # (in, out) layout
    w1 = 0.1 * jax.random.normal(k1, (state_size, feature_size), dtype=jnp.float32)
    b1 = 0.1 * jax.random.normal(k2, (1, feature_size), dtype=jnp.float32)
    w2 = 0.1 * jax.random.normal(k3, (feature_size, AF), dtype=jnp.float32)
    b2 = 0.1 * jax.random.normal(k4, (1, AF), dtype=jnp.float32)

    def ref_linear(x):
        return (x @ w_ones).reshape(-1, action_size, feature_size)

    def ref_mlp(x):
        return (jnp.maximum(x @ w1 + b1, 0.0) @ w2 + b2).reshape(
            -1, action_size, feature_size
        )

    def check(name, y, ref, atol=1e-4, rtol=1e-4):
        assert y.shape == ref.shape, (name, y.shape, ref.shape)
        assert jnp.allclose(y, ref, atol=atol, rtol=rtol), name

    # f32 path (exact module semantics):
    #   batch=8    -> single tile (TB = B)
    #   batch=600  -> single 600-row tile (no pad-to-1024 waste anymore)
    #   batch=2600 -> 2 grid steps with a ragged (masked) last block
    for batch, kb in ((8, kx), (600, kx2), (2600, kx3)):
        x = jax.random.normal(kb, (batch, state_size), dtype=jnp.float32)

        y_lin = jax.block_until_ready(
            psi_forward_linear(x, w_ones, action_size, feature_size)
        )
        check(f"linear_b{batch}", y_lin, ref_linear(x))

        y_mlp = jax.block_until_ready(
            psi_forward_network(x, w1, b1, w2, b2, action_size, feature_size)
        )
        check(f"mlp_b{batch}", y_mlp, ref_mlp(x))

    # Optional bf16-operand path (HBM-read win; f32 accumulation + f32 output).
    xb = jax.random.normal(kx2, (600, state_size), dtype=jnp.float32)

    y_lin_bf = jax.block_until_ready(
        psi_forward_linear(xb, w_ones, action_size, feature_size,
                           compute_dtype=jnp.bfloat16)
    )
    ref_lin_bf = jnp.dot(
        xb.astype(jnp.bfloat16), w_ones.astype(jnp.bfloat16),
        preferred_element_type=jnp.float32,
    ).reshape(-1, action_size, feature_size)
    check("linear_bf16", y_lin_bf, ref_lin_bf, atol=2e-2, rtol=2e-2)

    y_mlp_bf = jax.block_until_ready(
        psi_forward_network(xb, w1, b1, w2, b2, action_size, feature_size,
                            compute_dtype=jnp.bfloat16)
    )
    check("mlp_bf16", y_mlp_bf, ref_mlp(xb), atol=5e-2, rtol=5e-2)

    print("KERNEL_OK")
</pallas_src>

<mosaic_0001>
module attributes {stable_mosaic.version = 11 : i64} {
  func.func @_psi_linear_kernel(%arg0: i32, %arg1: memref<8x32xf32, #tpu.memory_space<vmem>>, %arg2: memref<32x128xf32, #tpu.memory_space<vmem>>, %arg3: memref<8x128xf32, #tpu.memory_space<vmem>>) attributes {dimension_semantics = [#tpu.dimension_semantics<parallel>], iteration_bounds = array<i64: 1>, scalar_prefetch = 0 : i64, scratch_operands = 0 : i64, tpu.core_type = #tpu.core_type<tc>, window_params = [{transform_indices = @transform_0, window_bounds = array<i64: 8, 32>}, {pipeline_mode = #tpu.pipeline_mode<synchronous>, transform_indices = @transform_1, window_bounds = array<i64: 32, 128>}, {transform_indices = @transform_2, window_bounds = array<i64: 8, 128>}]} {
    %c0 = arith.constant 0 : index
    %c0_0 = arith.constant 0 : index
    %0 = vector.load %arg1[%c0, %c0_0] : memref<8x32xf32, #tpu.memory_space<vmem>>, vector<8x32xf32>
    %c0_1 = arith.constant 0 : index
    %c0_2 = arith.constant 0 : index
    %1 = vector.load %arg2[%c0_1, %c0_2] : memref<32x128xf32, #tpu.memory_space<vmem>>, vector<32x128xf32>
    %cst = arith.constant dense<0.000000e+00> : vector<8x128xf32>
    %2 = tpu.matmul %0, %1, %cst {dimension_numbers = #tpu.dot_dimension_numbers<[1], [0], [0], [1], [0, 0, 1, 1], [], []>} : vector<8x32xf32>, vector<32x128xf32>, vector<8x128xf32> -> vector<8x128xf32>
    %c0_3 = arith.constant 0 : index
    %c0_4 = arith.constant 0 : index
    %3 = vector.load %arg3[%c0_3, %c0_4] : memref<8x128xf32, #tpu.memory_space<vmem>>, vector<8x128xf32>
    tpu.vector_store %arg3[%c0_3, %c0_4], %2 {strides = array<i32>} : memref<8x128xf32, #tpu.memory_space<vmem>>, vector<8x128xf32>,
    return
  }
  func.func @transform_0(%arg0: i32) -> (i32, i32) {
    %c0_i32 = arith.constant 0 : i32
    %c0_i32_0 = arith.constant 0 : i32
    return %arg0, %c0_i32 : i32, i32
  }
  func.func @transform_1(%arg0: i32) -> (i32, i32) {
    %c0_i32 = arith.constant 0 : i32
    %c0_i32_0 = arith.constant 0 : i32
    %c0_i32_1 = arith.constant 0 : i32
    return %c0_i32, %c0_i32_0 : i32, i32
  }
  func.func @transform_2(%arg0: i32) -> (i32, i32) {
    %c0_i32 = arith.constant 0 : i32
    %c0_i32_0 = arith.constant 0 : i32
    return %arg0, %c0_i32 : i32, i32
  }
}

</mosaic_0001>

<bundles_post_ra>
// kernel: tpu_custom_call.1
= control target key start
LH: loop header
LB: loop body
LE: loop exit
PB: predicated region body
PF: predicated region fallthrough
CT: control target
= control target key end

     0   :  { %7 = vsyncpa [#allocation3], 0  ;;  %s203_s0 = inlined_call_operand.hbm [shape: f32[8,32], index: 0, kind: input, shape index: {}]   ;;  %s204_s1 = inlined_call_operand.hbm [shape: f32[32,128], index: 1, kind: input, shape index: {}]   ;;  %s205_s2 = inlined_call_operand.hbm [shape: f32[8,128], index: 2, kind: output, shape index: {}]  }
   0x1   :  { %8 = vsyncpa [#allocation6], 0 }
   0x2   :  { %9 = vsyncpa [#allocation4], 0  ;;  %s15_s11 = sshll.u32 %s203_s0, 4  ;;  %s174_s12 = smov [#allocation2]   ;;  %s16_s11 = int_to_ptr.hbm [resolvable:$true] %s15_s11 }
   0x3   :  { %s17_s13 = sshll.u32 %s174_s12, 4  ;;  %s25_s16 = sshll.u32 %s204_s1, 4  ;;  %s18_s13 = int_to_ptr.vmem [resolvable:$true] %s17_s13  ;;  %s26_s16 = int_to_ptr.hbm [resolvable:$true] %s25_s16 }
   0x4   :  { %20 = dma.hbm_to_vmem [thread:$0]  %s16_s11, 128, %s18_s13, [#allocation3]  }
   0x5   :  { %s175_s17 = smov [#allocation5]   ;;  %s176_s19 = smov 128  }
   0x6   :  { %s27_s18 = sshll.u32 %s175_s17, 4  ;;  %s177_s20 = smov 8   ;;  %s28_s18 = int_to_ptr.vmem [resolvable:$true] %s27_s18 }
   0x7   :  { %33 = dma.hbm_to_vmem [thread:$0]  %s26_s16, 512, %s28_s18, [#allocation6], %s176_s19, %s176_s19, %s177_s20  }
   0x8   :  { %168 = dma.done.wait [#allocation3], 128  }
   0x9   :  { %169 = vsyncadd [#allocation3], 4294967168 }
   0xa   :  { %170 = dma.done.wait [#allocation6], 512  }
   0xb   :  { %171 = vsyncadd [#allocation6], 4294966784  ;;  %v46_v0 = vld [vmem:[#allocation5 + $0x18] sm:$0xff]  ;;  %v45_v1 = vld [vmem:[#allocation5 + $0x10] sm:$0xff]  ;;  %vm47_vm0 = vcmask 261120   ;;  %s178_s0 = smov [#allocation7]  }
   0xc   :  { %63 = vmatpush.msra.mxu0 %v46_v0  ;;  %v44_v2 = vld [vmem:[#allocation5 + $0x8] sm:$0xff]  ;;  %v43_v3 = vld [vmem:[#allocation5] sm:$0xff]  ;;  %v42_v4 = vld [vmem:[#allocation2] sm:$0xff]  ;;  %s77_s1 = sshll.u32 %s178_s0, 4  ;;  %s79_s23 = sshll.u32 %s205_s2, 4  ;;  %s78_s1 = int_to_ptr.vmem [resolvable:$true] %s77_s1  ;;  %s80_s23 = int_to_ptr.hbm [resolvable:$true] %s79_s23 }
   0xe   :  { %64 = vmatpush.msra.mxu0 %v45_v1 }
  0x10   :  { %65 = vmatpush.msra.mxu0 %v44_v2 }
  0x12   :  { %66 = vmatpush.msra.mxu0 %v43_v3 }
  0x13   :  { %90 = vmatmul.msk.f32.vlgmr.msra.gmra.mxu0 %vm47_vm0, %v42_v4 }
  0x90   :  { %v68_v5 = vpop.f32.mrf.mxu0 }
  0x91   :  { %71 = vst [vmem:[#allocation7] sm:$0xff] %v68_v5 }
  0x92   :  { %82 = dma.vmem_to_hbm [thread:$0]  %s78_s1, 128, %s80_s23, [#allocation4]  }
  0x93   :  { %172 = dma.done.wait [#allocation4], 128  }
  0x94   :  { %173 = vsyncadd [#allocation4], 4294967168 }
  0x95   :  { %87 = vsyncpa [#allocation3], 1 }
  0x96   :  { %88 = vsyncpa [#allocation6], 1 }
  0x97   :  { %89 = vsyncpa [#allocation4], 1 }

</bundles_post_ra>
